<compile_context>
chip_gen: v5e
topology: v5e:2x2
jax: 0.10.0
libtpu: 0.0.40
codegen_flags: <defaults>
</compile_context>

<pallas_src>
import jax
import jax.numpy as jnp
from jax.experimental import pallas as pl
from jax.experimental.pallas import tpu as pltpu

EPS = 1e-5

K_IN = 879      # real fc1 contraction dim
K_PAD = 896     # padded to 7 * 128
H1 = 100        # real fc1 width
H1_PAD = 128    # padded to one lane tile
H2 = 24

# packed-parameter layout (f32, shape (136, 128)):
#   [0:100,   0:24]   w2      (rows 100..127 stay zero -> padded h1 cols inert)
#   [128,     0:128]  gamma1  (padded cols = 0)
#   [129,     0:128]  beta1   (padded cols = 0)
#   [130,     0:24]   gamma2
#   [131,     0:24]   beta2
#   [132,     0:24]   w3 row  (w3.T)
#   [133,     0]      b3
_PACK_ROWS, _PACK_COLS = 136, 128


def _sigmoid_approx(z):
    # exp + approx reciprocal both land on the otherwise-idle EUP slot.
    return pl.reciprocal(1.0 + jnp.exp(-z), approx=True)


def _bn_train(h, gamma, beta):
    # Training-mode BatchNorm1d: batch mean / biased variance, affine folded
    # into a single per-feature scale/shift -> one (B, F) FMA-style pass.
    mean = jnp.mean(h, axis=0, keepdims=True)
    var = jnp.mean((h - mean) ** 2, axis=0, keepdims=True)
    scale = gamma * jax.lax.rsqrt(var + EPS)     # (1, F)
    shift = beta - mean * scale                  # (1, F)
    return h * scale + shift


def deepnet2_kernel(x_ref, w1_ref, p_ref, out_ref):
    x = x_ref[...]                                      # (BB, 896) bf16

    # ---- fc1 (bias cancels in training-mode BN) -> BN -> sigmoid ----
    h1 = jnp.dot(x, w1_ref[...], preferred_element_type=jnp.float32)  # (BB,128) f32
    g1 = p_ref[128:129, :]                              # (1, 128), padded cols 0
    be1 = p_ref[129:130, :]
    h1 = _sigmoid_approx(_bn_train(h1, g1, be1))        # padded cols -> 0.5 (inert)

    # ---- fc2 (bias dropped) -> BN -> sigmoid; bf16 MXU operands, f32 accum ----
    w2 = p_ref[0:128, 0:24].astype(jnp.bfloat16)        # zero rows 100..127
    h2 = jnp.dot(h1.astype(jnp.bfloat16), w2,
                 preferred_element_type=jnp.float32)    # (BB, 24) f32
    g2 = p_ref[130:131, 0:24]
    be2 = p_ref[131:132, 0:24]
    h2 = _sigmoid_approx(_bn_train(h2, g2, be2))

    # ---- fc3 on VPU/XLU (no 1-lane MXU pop) -> exact sigmoid ----
    w3 = p_ref[132:133, 0:24]                           # (1, 24)
    b3 = p_ref[133:134, 0:1]                            # (1, 1)
    h3 = jnp.sum(h2 * w3, axis=-1, keepdims=True) + b3  # (BB, 1)
    out_ref[...] = 1.0 / (1.0 + jnp.exp(-h3))


def deepnet2_forward(x, w1_packed, packed, *, batch_block=None):
    """x: (B, 879) f32. Padding/casting done here (wrapper side).

    batch_block: rows per grid step. Default = whole batch (single grid point,
    exact torch whole-batch BN semantics). Set it (multiple of 16) only when
    running many *independent* blocks; BN stats then become per-block."""
    B = x.shape[0]
    bb = B if batch_block is None else batch_block
    assert B % bb == 0
    n_blocks = B // bb
    if n_blocks > 1:
        assert bb % 16 == 0, "bf16 x blocks need 16-row multiples when gridded"

    # Pad contraction dim to 896 and cast to bf16 (halves the x DMA).
    xp = jnp.zeros((B, K_PAD), jnp.float32).at[:, :K_IN].set(x).astype(jnp.bfloat16)

    grid_spec = pltpu.PrefetchScalarGridSpec(
        num_scalar_prefetch=0,
        grid=(n_blocks,),
        in_specs=[
            pl.BlockSpec((bb, K_PAD), lambda i: (i, 0)),
            pl.BlockSpec((K_PAD, H1_PAD), lambda i: (0, 0)),           # resident
            pl.BlockSpec((_PACK_ROWS, _PACK_COLS), lambda i: (0, 0)),  # resident
        ],
        out_specs=pl.BlockSpec((bb, 1), lambda i: (i, 0)),
    )
    return pl.pallas_call(
        deepnet2_kernel,
        out_shape=jax.ShapeDtypeStruct((B, 1), jnp.float32),
        grid_spec=grid_spec,
        compiler_params=pltpu.CompilerParams(
            dimension_semantics=("parallel",)),
    )(xp, w1_packed, packed)


def init_params(key):
    """Deterministic init matching torch module shapes/defaults.
    nn.Linear: U(-1/sqrt(fan_in), 1/sqrt(fan_in)) for weight and bias.
    nn.BatchNorm1d: gamma=1, beta=0. Weights stored (in, out)."""
    dims = [(K_IN, H1), (H1, H2), (H2, 1)]
    keys = jax.random.split(key, 2 * len(dims))
    lin = []
    for i, (fan_in, fan_out) in enumerate(dims):
        k = 1.0 / jnp.sqrt(jnp.float32(fan_in))
        w = jax.random.uniform(keys[2 * i], (fan_in, fan_out),
                               jnp.float32, minval=-k, maxval=k)
        b = jax.random.uniform(keys[2 * i + 1], (1, fan_out),
                               jnp.float32, minval=-k, maxval=k)
        lin.append((w, b))
    (w1, b1), (w2, b2), (w3, b3) = lin
    g1 = jnp.ones((1, H1), jnp.float32)
    be1 = jnp.zeros((1, H1), jnp.float32)
    g2 = jnp.ones((1, H2), jnp.float32)
    be2 = jnp.zeros((1, H2), jnp.float32)
    return (w1, b1, g1, be1, w2, b2, g2, be2, w3, b3)


def pack_params(params):
    """w1 -> zero-padded (896,128) bf16; everything else into one (136,128) f32
    buffer. b1/b2 are dropped (they cancel in training-mode BN)."""
    (w1, b1, g1, be1, w2, b2, g2, be2, w3, b3) = params
    del b1, b2
    w1p = (jnp.zeros((K_PAD, H1_PAD), jnp.float32)
           .at[:K_IN, :H1].set(w1)
           .astype(jnp.bfloat16))
    packed = jnp.zeros((_PACK_ROWS, _PACK_COLS), jnp.float32)
    packed = packed.at[0:H1, 0:H2].set(w2)            # rows 100..127 stay zero
    packed = packed.at[128:129, 0:H1].set(g1)         # padded gamma cols stay 0
    packed = packed.at[129:130, 0:H1].set(be1)
    packed = packed.at[130:131, 0:H2].set(g2)
    packed = packed.at[131:132, 0:H2].set(be2)
    packed = packed.at[132:133, 0:H2].set(w3.T)       # (1, 24)
    packed = packed.at[133:134, 0:1].set(b3)          # (1, 1)
    return w1p, packed


def deepnet2_reference(x, params):
    """Pure-JAX f32 reference with exact torch training-mode semantics."""
    (w1, b1, g1, be1, w2, b2, g2, be2, w3, b3) = params

    def bn(h, g, be):
        m = jnp.mean(h, axis=0, keepdims=True)
        v = jnp.mean((h - m) ** 2, axis=0, keepdims=True)
        return (h - m) * jax.lax.rsqrt(v + EPS) * g + be

    h = jax.nn.sigmoid(bn(x @ w1 + b1, g1, be1))
    h = jax.nn.sigmoid(bn(h @ w2 + b2, g2, be2))
    return jax.nn.sigmoid(h @ w3 + b3)


if __name__ == "__main__":
    key = jax.random.PRNGKey(0)
    k_x, k_p = jax.random.split(key)
    B = 8
    x = jax.random.normal(k_x, (B, K_IN), dtype=jnp.float32)
    params = init_params(k_p)
    w1_packed, packed = pack_params(params)

    out = deepnet2_forward(x, w1_packed, packed)
    out = jax.block_until_ready(out)

    ref = deepnet2_reference(x, params)
    assert out.shape == (B, 1) and out.dtype == jnp.float32
    assert bool(jnp.all(jnp.isfinite(out)))
    assert bool(jnp.all((out > 0.0) & (out < 1.0)))          # sigmoid range
    assert bool(jnp.allclose(out, ref, atol=3e-2)), (out, ref)  # bf16/approx tol
    print("KERNEL_OK")
</pallas_src>

<mosaic_0001>
module attributes {stable_mosaic.version = 11 : i64} {
  func.func @deepnet2_kernel(%arg0: i32, %arg1: memref<8x896xbf16, #tpu.memory_space<vmem>>, %arg2: memref<896x128xbf16, #tpu.memory_space<vmem>>, %arg3: memref<136x128xf32, #tpu.memory_space<vmem>>, %arg4: memref<8x1xf32, #tpu.memory_space<vmem>>) attributes {dimension_semantics = [#tpu.dimension_semantics<parallel>], iteration_bounds = array<i64: 1>, scalar_prefetch = 0 : i64, scratch_operands = 0 : i64, tpu.core_type = #tpu.core_type<tc>, window_params = [{transform_indices = @transform_0, window_bounds = array<i64: 8, 896>}, {pipeline_mode = #tpu.pipeline_mode<synchronous>, transform_indices = @transform_1, window_bounds = array<i64: 896, 128>}, {pipeline_mode = #tpu.pipeline_mode<synchronous>, transform_indices = @transform_2, window_bounds = array<i64: 136, 128>}, {transform_indices = @transform_3, window_bounds = array<i64: 8, 1>}]} {
    %c0 = arith.constant 0 : index
    %c0_0 = arith.constant 0 : index
    %0 = vector.load %arg1[%c0, %c0_0] : memref<8x896xbf16, #tpu.memory_space<vmem>>, vector<8x896xbf16>
    %c0_1 = arith.constant 0 : index
    %c0_2 = arith.constant 0 : index
    %1 = vector.load %arg2[%c0_1, %c0_2] : memref<896x128xbf16, #tpu.memory_space<vmem>>, vector<896x128xbf16>
    %cst = arith.constant dense<0.000000e+00> : vector<8x128xf32>
    %2 = tpu.matmul %0, %1, %cst {dimension_numbers = #tpu.dot_dimension_numbers<[1], [0], [0], [1], [0, 0, 1, 1], [], []>} : vector<8x896xbf16>, vector<896x128xbf16>, vector<8x128xf32> -> vector<8x128xf32>
    %c128 = arith.constant 128 : index
    %c0_3 = arith.constant 0 : index
    %3 = vector.load %arg3[%c128, %c0_3] : memref<136x128xf32, #tpu.memory_space<vmem>>, vector<1x128xf32>
    %c129 = arith.constant 129 : index
    %c0_4 = arith.constant 0 : index
    %4 = vector.load %arg3[%c129, %c0_4] : memref<136x128xf32, #tpu.memory_space<vmem>>, vector<1x128xf32>
    %cst_5 = arith.constant dense<0.000000e+00> : vector<128xf32>
    %5 = vector.multi_reduction <add>, %2, %cst_5 [0] : vector<8x128xf32> to vector<128xf32>
    %6 = vector.shape_cast %5 : vector<128xf32> to vector<1x128xf32>
    %cst_6 = arith.constant 8.000000e+00 : f32
    %7 = vector.broadcast %cst_6 : f32 to vector<1x128xf32>
    %8 = arith.divf %6, %7 : vector<1x128xf32>
    %9 = vector.broadcast %8 : vector<1x128xf32> to vector<8x128xf32>
    %10 = arith.subf %2, %9 : vector<8x128xf32>
    %11 = arith.mulf %10, %10 : vector<8x128xf32>
    %cst_7 = arith.constant dense<0.000000e+00> : vector<128xf32>
    %12 = vector.multi_reduction <add>, %11, %cst_7 [0] : vector<8x128xf32> to vector<128xf32>
    %13 = vector.shape_cast %12 : vector<128xf32> to vector<1x128xf32>
    %cst_8 = arith.constant 8.000000e+00 : f32
    %14 = vector.broadcast %cst_8 : f32 to vector<1x128xf32>
    %15 = arith.divf %13, %14 : vector<1x128xf32>
    %cst_9 = arith.constant 9.99999974E-6 : f32
    %16 = vector.broadcast %cst_9 : f32 to vector<1x128xf32>
    %17 = arith.addf %15, %16 : vector<1x128xf32>
    %18 = math.rsqrt %17 : vector<1x128xf32>
    %19 = arith.mulf %3, %18 : vector<1x128xf32>
    %20 = arith.mulf %8, %19 : vector<1x128xf32>
    %21 = arith.subf %4, %20 : vector<1x128xf32>
    %22 = vector.broadcast %19 : vector<1x128xf32> to vector<8x128xf32>
    %23 = arith.mulf %2, %22 : vector<8x128xf32>
    %24 = vector.broadcast %21 : vector<1x128xf32> to vector<8x128xf32>
    %25 = arith.addf %23, %24 : vector<8x128xf32>
    %cst_10 = arith.constant 0.000000e+00 : f32
    %26 = vector.broadcast %cst_10 : f32 to vector<8x128xf32>
    %27 = arith.subf %26, %25 : vector<8x128xf32>
    %28 = math.exp %27 : vector<8x128xf32>
    %cst_11 = arith.constant 1.000000e+00 : f32
    %29 = vector.broadcast %cst_11 : f32 to vector<8x128xf32>
    %30 = arith.addf %29, %28 : vector<8x128xf32>
    %31 = tpu.reciprocal %30 {approx = true} : vector<8x128xf32> -> vector<8x128xf32>
    %c0_12 = arith.constant 0 : index
    %c0_13 = arith.constant 0 : index
    %32 = vector.load %arg3[%c0_12, %c0_13] : memref<136x128xf32, #tpu.memory_space<vmem>>, vector<128x24xf32>
    %33 = arith.truncf %32 : vector<128x24xf32> to vector<128x24xbf16>
    %34 = arith.truncf %31 : vector<8x128xf32> to vector<8x128xbf16>
    %cst_14 = arith.constant dense<0.000000e+00> : vector<8x24xf32>
    %35 = tpu.matmul %34, %33, %cst_14 {dimension_numbers = #tpu.dot_dimension_numbers<[1], [0], [0], [1], [0, 0, 1, 1], [], []>} : vector<8x128xbf16>, vector<128x24xbf16>, vector<8x24xf32> -> vector<8x24xf32>
    %c130 = arith.constant 130 : index
    %c0_15 = arith.constant 0 : index
    %36 = vector.load %arg3[%c130, %c0_15] : memref<136x128xf32, #tpu.memory_space<vmem>>, vector<1x24xf32>
    %c131 = arith.constant 131 : index
    %c0_16 = arith.constant 0 : index
    %37 = vector.load %arg3[%c131, %c0_16] : memref<136x128xf32, #tpu.memory_space<vmem>>, vector<1x24xf32>
    %cst_17 = arith.constant dense<0.000000e+00> : vector<24xf32>
    %38 = vector.multi_reduction <add>, %35, %cst_17 [0] : vector<8x24xf32> to vector<24xf32>
    %39 = vector.shape_cast %38 : vector<24xf32> to vector<1x24xf32>
    %cst_18 = arith.constant 8.000000e+00 : f32
    %40 = vector.broadcast %cst_18 : f32 to vector<1x24xf32>
    %41 = arith.divf %39, %40 : vector<1x24xf32>
    %42 = vector.broadcast %41 : vector<1x24xf32> to vector<8x24xf32>
    %43 = arith.subf %35, %42 : vector<8x24xf32>
    %44 = arith.mulf %43, %43 : vector<8x24xf32>
    %cst_19 = arith.constant dense<0.000000e+00> : vector<24xf32>
    %45 = vector.multi_reduction <add>, %44, %cst_19 [0] : vector<8x24xf32> to vector<24xf32>
    %46 = vector.shape_cast %45 : vector<24xf32> to vector<1x24xf32>
    %cst_20 = arith.constant 8.000000e+00 : f32
    %47 = vector.broadcast %cst_20 : f32 to vector<1x24xf32>
    %48 = arith.divf %46, %47 : vector<1x24xf32>
    %cst_21 = arith.constant 9.99999974E-6 : f32
    %49 = vector.broadcast %cst_21 : f32 to vector<1x24xf32>
    %50 = arith.addf %48, %49 : vector<1x24xf32>
    %51 = math.rsqrt %50 : vector<1x24xf32>
    %52 = arith.mulf %36, %51 : vector<1x24xf32>
    %53 = arith.mulf %41, %52 : vector<1x24xf32>
    %54 = arith.subf %37, %53 : vector<1x24xf32>
    %55 = vector.broadcast %52 : vector<1x24xf32> to vector<8x24xf32>
    %56 = arith.mulf %35, %55 : vector<8x24xf32>
    %57 = vector.broadcast %54 : vector<1x24xf32> to vector<8x24xf32>
    %58 = arith.addf %56, %57 : vector<8x24xf32>
    %cst_22 = arith.constant 0.000000e+00 : f32
    %59 = vector.broadcast %cst_22 : f32 to vector<8x24xf32>
    %60 = arith.subf %59, %58 : vector<8x24xf32>
    %61 = math.exp %60 : vector<8x24xf32>
    %cst_23 = arith.constant 1.000000e+00 : f32
    %62 = vector.broadcast %cst_23 : f32 to vector<8x24xf32>
    %63 = arith.addf %62, %61 : vector<8x24xf32>
    %64 = tpu.reciprocal %63 {approx = true} : vector<8x24xf32> -> vector<8x24xf32>
    %c132 = arith.constant 132 : index
    %c0_24 = arith.constant 0 : index
    %65 = vector.load %arg3[%c132, %c0_24] : memref<136x128xf32, #tpu.memory_space<vmem>>, vector<1x24xf32>
    %c133 = arith.constant 133 : index
    %c0_25 = arith.constant 0 : index
    %66 = vector.load %arg3[%c133, %c0_25] : memref<136x128xf32, #tpu.memory_space<vmem>>, vector<1x1xf32>
    %67 = vector.broadcast %65 : vector<1x24xf32> to vector<8x24xf32>
    %68 = arith.mulf %64, %67 : vector<8x24xf32>
    %cst_26 = arith.constant dense<0.000000e+00> : vector<8xf32>
    %69 = vector.multi_reduction <add>, %68, %cst_26 [1] : vector<8x24xf32> to vector<8xf32>
    %70 = vector.shape_cast %69 : vector<8xf32> to vector<8x1xf32>
    %71 = vector.broadcast %66 : vector<1x1xf32> to vector<8x1xf32>
    %72 = arith.addf %70, %71 : vector<8x1xf32>
    %cst_27 = arith.constant 0.000000e+00 : f32
    %73 = vector.broadcast %cst_27 : f32 to vector<8x1xf32>
    %74 = arith.subf %73, %72 : vector<8x1xf32>
    %75 = math.exp %74 : vector<8x1xf32>
    %cst_28 = arith.constant 1.000000e+00 : f32
    %76 = vector.broadcast %cst_28 : f32 to vector<8x1xf32>
    %77 = arith.addf %76, %75 : vector<8x1xf32>
    %cst_29 = arith.constant 1.000000e+00 : f32
    %78 = vector.broadcast %cst_29 : f32 to vector<8x1xf32>
    %79 = arith.divf %78, %77 : vector<8x1xf32>
    %c0_30 = arith.constant 0 : index
    %c0_31 = arith.constant 0 : index
    %80 = vector.load %arg4[%c0_30, %c0_31] : memref<8x1xf32, #tpu.memory_space<vmem>>, vector<8x1xf32>
    tpu.vector_store %arg4[%c0_30, %c0_31], %79 {strides = array<i32>} : memref<8x1xf32, #tpu.memory_space<vmem>>, vector<8x1xf32>,
    return
  }
  func.func @transform_0(%arg0: i32) -> (i32, i32) {
    %c0_i32 = arith.constant 0 : i32
    %c0_i32_0 = arith.constant 0 : i32
    return %arg0, %c0_i32 : i32, i32
  }
  func.func @transform_1(%arg0: i32) -> (i32, i32) {
    %c0_i32 = arith.constant 0 : i32
    %c0_i32_0 = arith.constant 0 : i32
    %c0_i32_1 = arith.constant 0 : i32
    return %c0_i32, %c0_i32_0 : i32, i32
  }
  func.func @transform_2(%arg0: i32) -> (i32, i32) {
    %c0_i32 = arith.constant 0 : i32
    %c0_i32_0 = arith.constant 0 : i32
    %c0_i32_1 = arith.constant 0 : i32
    return %c0_i32, %c0_i32_0 : i32, i32
  }
  func.func @transform_3(%arg0: i32) -> (i32, i32) {
    %c0_i32 = arith.constant 0 : i32
    %c0_i32_0 = arith.constant 0 : i32
    return %arg0, %c0_i32 : i32, i32
  }
}

</mosaic_0001>

<bundles_post_ra>
// kernel: tpu_custom_call.1
= control target key start
LH: loop header
LB: loop body
LE: loop exit
PB: predicated region body
PF: predicated region fallthrough
CT: control target
= control target key end

     0   :  { %8 = vsyncpa [#allocation3], 0  ;;  %s1232_s0 = inlined_call_operand.hbm [shape: bf16[8,896], index: 0, kind: input, shape index: {}]   ;;  %s1233_s1 = inlined_call_operand.hbm [shape: bf16[896,128], index: 1, kind: input, shape index: {}]   ;;  %s1234_s2 = inlined_call_operand.hbm [shape: f32[136,128], index: 2, kind: input, shape index: {}]   ;;  %s1235_s3 = inlined_call_operand.vmem [shape: f32[8,1], index: 3, kind: output, shape index: {}]  }
   0x1   :  { %9 = vsyncpa [#allocation5], 0  ;;  %s25_s14 = sshll.u32 %s1233_s1, 4  ;;  %s1177_s15 = smov [#allocation4]   ;;  %s26_s14 = int_to_ptr.hbm [resolvable:$true] %s25_s14 }
   0x2   :  { %s27_s16 = sshll.u32 %s1177_s15, 4  ;;  %s15_s19 = sshll.u32 %s1232_s0, 4  ;;  %s28_s16 = int_to_ptr.vmem [resolvable:$true] %s27_s16  ;;  %s16_s19 = int_to_ptr.hbm [resolvable:$true] %s15_s19 }
   0x3   :  { %s1178_s20 = smov 64   ;;  %s1179_s21 = smov 4  }
   0x4   :  { %33 = dma.hbm_to_vmem [thread:$0]  %s26_s14, 7168, %s28_s16, [#allocation5], %s1178_s20, %s1178_s20, %s1179_s21  }
   0x5   :  { %s1180_s22 = smov [#allocation2]   ;;  %s38_s26 = sshll.u32 %s1234_s2, 4  ;;  %s39_s26 = int_to_ptr.hbm [resolvable:$true] %s38_s26 }
   0x6   :  { %s17_s23 = sshll.u32 %s1180_s22, 4  ;;  %s1181_s1 = smov [#allocation6]   ;;  %s18_s23 = int_to_ptr.vmem [resolvable:$true] %s17_s23 }
   0x7   :  { %20 = dma.hbm_to_vmem [thread:$0]  %s16_s19, 448, %s18_s23, [#allocation3]  }
   0x8   :  { %s40_s27 = sshll.u32 %s1181_s1, 4  ;;  %s1182_s28 = smov 128   ;;  %s41_s27 = int_to_ptr.vmem [resolvable:$true] %s40_s27 }
   0x9   :  { %s1183_s29 = smov 8  }
   0xa   :  { %46 = dma.hbm_to_vmem [thread:$0]  %s39_s26, 2176, %s41_s27, [#allocation5], %s1182_s28, %s1182_s28, %s1183_s29  }
   0xb   :  { %1173 = dma.done.wait [#allocation3], 448  }
   0xc   :  { %1174 = vsyncadd [#allocation3], 4294966848 }
   0xd   :  { %1175 = dma.done.wait [#allocation5], 9344  }
   0xe   :  { %1176 = vsyncadd [#allocation5], 4294957952  ;;  %v1024_v0 = vld [vmem:[#allocation4 + $0x38] sm:$0xff]  ;;  %v1023_v3 = vld [vmem:[#allocation4 + $0x30] sm:$0xff]  ;;  %vm715_vm4 = vcmask 195584   ;;  %vm785_vm11 = vcmask 7168  }
   0xf   :  { %v1032_v1 = vld [vmem:[#allocation4 + $0x78] sm:$0xff]  ;;  %536 = vmatpush.bf16.msra.mxu0 %v1024_v0  ;;  %v1031_v4 = vld [vmem:[#allocation4 + $0x70] sm:$0xff]  ;;  %v1022_v7 = vld [vmem:[#allocation4 + $0x28] sm:$0xff] }
  0x10   :  { %v1040_v2 = vld [vmem:[#allocation4 + $0xb8] sm:$0xff]  ;;  %549 = vmatpush.bf16.msra.mxu1 %v1032_v1  ;;  %v1039_v5 = vld [vmem:[#allocation4 + $0xb0] sm:$0xff]  ;;  %v1030_v8 = vld [vmem:[#allocation4 + $0x68] sm:$0xff] }
  0x11   :  { %562 = vmatpush.bf16.msra.mxu2 %v1040_v2  ;;  %v1048_v6 = vld [vmem:[#allocation4 + $0xf8] sm:$0xff]  ;;  %v1038_v9 = vld [vmem:[#allocation4 + $0xa8] sm:$0xff]  ;;  %v1047_v10 = vld [vmem:[#allocation4 + $0xf0] sm:$0xff] }
  0x12   :  { %575 = vmatpush.bf16.msra.mxu3 %v1048_v6  ;;  %v1021_v11 = vld [vmem:[#allocation4 + $0x20] sm:$0xff]  ;;  %v1046_v14 = vld [vmem:[#allocation4 + $0xe8] sm:$0xff]  ;;  %v1020_v15 = vld [vmem:[#allocation4 + $0x18] sm:$0xff] }
  0x13   :  { %537 = vmatpush.bf16.msra.mxu0 %v1023_v3  ;;  %v1029_v12 = vld [vmem:[#allocation4 + $0x60] sm:$0xff]  ;;  %v1028_v16 = vld [vmem:[#allocation4 + $0x58] sm:$0xff]  ;;  %v1019_v19 = vld [vmem:[#allocation4 + $0x10] sm:$0xff] }
  0x14   :  { %550 = vmatpush.bf16.msra.mxu1 %v1031_v4  ;;  %v1037_v13 = vld [vmem:[#allocation4 + $0xa0] sm:$0xff]  ;;  %v1036_v17 = vld [vmem:[#allocation4 + $0x98] sm:$0xff]  ;;  %v1027_v20 = vld [vmem:[#allocation4 + $0x50] sm:$0xff] }
  0x15   :  { %563 = vmatpush.bf16.msra.mxu2 %v1039_v5  ;;  %v1045_v18 = vld [vmem:[#allocation4 + $0xe0] sm:$0xff]  ;;  %v1035_v21 = vld [vmem:[#allocation4 + $0x90] sm:$0xff]  ;;  %v1044_v22 = vld [vmem:[#allocation4 + $0xd8] sm:$0xff] }
  0x16   :  { %576 = vmatpush.bf16.msra.mxu3 %v1047_v10  ;;  %v1018_v23 = vld [vmem:[#allocation4 + $0x8] sm:$0xff]  ;;  %v1043_v27 = vld [vmem:[#allocation4 + $0xd0] sm:$0xff]  ;;  %v1017_v30 = vld [vmem:[#allocation4] sm:$0xff] }
  0x17   :  { %538 = vmatpush.bf16.msra.mxu0 %v1022_v7  ;;  %v1026_v24 = vld [vmem:[#allocation4 + $0x48] sm:$0xff]  ;;  %v1025_v31 = vld [vmem:[#allocation4 + $0x40] sm:$0xff]  ;;  %v1056_v35 = vld [vmem:[#allocation4 + $0x138] sm:$0xff] }
  0x18   :  { %551 = vmatpush.bf16.msra.mxu1 %v1030_v8  ;;  %v59_v25 = vld [vmem:[#allocation2] sm:$0xff]  ;;  %v60_v28 = vld [vmem:[#allocation2 + $0x8] sm:$0xff]  ;;  %v1064_v36 = vld [vmem:[#allocation4 + $0x178] sm:$0xff] }
  0x19   :  { %564 = vmatpush.bf16.msra.mxu2 %v1038_v9  ;;  %v1034_v26 = vld [vmem:[#allocation4 + $0x88] sm:$0xff]  ;;  %v179_v29 = vunpack.c.l.b16 %v59_v25  ;;  %v181_v32 = vunpack.c.l.b16 %v60_v28  ;;  %v180_v33 = vunpack.c.h.b16 %v59_v25  ;;  %v1033_v34 = vld [vmem:[#allocation4 + $0x80] sm:$0xff]  ;;  %v1072_v37 = vld [vmem:[#allocation4 + $0x1b8] sm:$0xff]  ;;  %v182_v46 = vunpack.c.h.b16 %v60_v28 }
  0x1a   :  { %577 = vmatpush.bf16.msra.mxu3 %v1046_v14  ;;  %v1042_v38 = vld [vmem:[#allocation4 + $0xc8] sm:$0xff]  ;;  %v1055_v42 = vld [vmem:[#allocation4 + $0x130] sm:$0xff]  ;;  %v1041_v45 = vld [vmem:[#allocation4 + $0xc0] sm:$0xff] }
  0x1b   :  { %539 = vmatpush.bf16.msra.mxu0 %v1021_v11  ;;  %v186_v39 = vpack.c.b16 %v179_v29, %v179_v29  ;;  %v188_v40 = vpack.c.b16 %v181_v32, %v181_v32  ;;  %v187_v41 = vpack.c.b16 %v180_v33, %v180_v33  ;;  %v1063_v43 = vld [vmem:[#allocation4 + $0x170] sm:$0xff]  ;;  %v1054_v47 = vld [vmem:[#allocation4 + $0x128] sm:$0xff]  ;;  %v189_v50 = vpack.c.b16 %v182_v46, %v182_v46  ;;  %v1053_v51 = vld [vmem:[#allocation4 + $0x120] sm:$0xff] }
  0x1c   :  { %552 = vmatpush.bf16.msra.mxu1 %v1029_v12  ;;  %v1071_v44 = vld [vmem:[#allocation4 + $0x1b0] sm:$0xff]  ;;  %v1062_v48 = vld [vmem:[#allocation4 + $0x168] sm:$0xff]  ;;  %v1061_v52 = vld [vmem:[#allocation4 + $0x160] sm:$0xff] }
  0x1d   :  { %565 = vmatpush.bf16.msra.mxu2 %v1037_v13  ;;  %v1070_v49 = vld [vmem:[#allocation4 + $0x1a8] sm:$0xff]  ;;  %v1069_v53 = vld [vmem:[#allocation4 + $0x1a0] sm:$0xff]  ;;  %v1052_v54 = vld [vmem:[#allocation4 + $0x118] sm:$0xff] }
  0x1e   :  { %578 = vmatpush.bf16.msra.mxu3 %v1045_v18  ;;  %v1060_v55 = vld [vmem:[#allocation4 + $0x158] sm:$0xff]  ;;  %v1051_v57 = vld [vmem:[#allocation4 + $0x110] sm:$0xff]  ;;  %v1050_v60 = vld [vmem:[#allocation4 + $0x108] sm:$0xff] }
  0x1f   :  { %540 = vmatpush.bf16.msra.mxu0 %v1020_v15  ;;  %v1068_v56 = vld [vmem:[#allocation4 + $0x198] sm:$0xff]  ;;  %v1059_v58 = vld [vmem:[#allocation4 + $0x150] sm:$0xff]  ;;  %v1058_v62 = vld [vmem:[#allocation4 + $0x148] sm:$0xff] }
  0x20   :  { %553 = vmatpush.bf16.msra.mxu1 %v1028_v16  ;;  %v1067_v59 = vld [vmem:[#allocation4 + $0x190] sm:$0xff]  ;;  %v1066_v63 = vld [vmem:[#allocation4 + $0x188] sm:$0xff]  ;;  %v62_v0 = vld [vmem:[#allocation2 + $0x18] sm:$0xf] }
  0x21   :  { %566 = vmatpush.bf16.msra.mxu2 %v1036_v17  ;;  %v61_v61 = vld [vmem:[#allocation2 + $0x10] sm:$0xff]  ;;  %v1049_v2 = vld [vmem:[#allocation4 + $0x100] sm:$0xff]  ;;  %v185_v4 = vunpack.c.l.b16 %v62_v0 }
  0x22   :  { %579 = vmatpush.bf16.msra.mxu3 %v1044_v22  ;;  %v183_v1 = vunpack.c.l.b16 %v61_v61  ;;  %v184_v3 = vunpack.c.h.b16 %v61_v61  ;;  %v1057_v5 = vld [vmem:[#allocation4 + $0x140] sm:$0xff]  ;;  %v684_v61 = vld [vmem:[#allocation6 + $0x48] sm:$0xff] }
  0x23   :  { %541 = vmatpush.bf16.msra.mxu0 %v1019_v19  ;;  %v1065_v6 = vld [vmem:[#allocation4 + $0x180] sm:$0xff]  ;;  %v192_v9 = vpack.c.b16 %v185_v4, %v185_v4  ;;  %v1184_v19 = vmov 8.0  }
  0x24   :  { %554 = vmatpush.bf16.msra.mxu1 %v1027_v20  ;;  %v190_v7 = vpack.c.b16 %v183_v1, %v183_v1  ;;  %v191_v8 = vpack.c.b16 %v184_v3, %v184_v3  ;;  %1083 = vrcp.f32 %v1184_v19  ;;  %v681_v1 = vld [vmem:[#allocation6 + $0x30] sm:$0xff]  ;;  %v627_v19 = vld [vmem:[#allocation6 + $0x80] sm:$0x1] }
  0x25   :  { %567 = vmatpush.bf16.msra.mxu2 %v1035_v21 }
  0x26   :  { %580 = vmatpush.bf16.msra.mxu3 %v1043_v27 }
  0x27   :  { %542 = vmatpush.bf16.msra.mxu0 %v1018_v23 }
  0x28   :  { %555 = vmatpush.bf16.msra.mxu1 %v1026_v24 }
  0x29   :  { %568 = vmatpush.bf16.msra.mxu2 %v1034_v26 }
  0x2a   :  { %581 = vmatpush.bf16.msra.mxu3 %v1042_v38  ;;  %v1084_v21 = vpop.eup %1083 }
  0x2b   :  { %543 = vmatpush.bf16.msra.mxu0 %v1017_v30  ;;  %v636_v26 = vmul.f32 8.0, %v1084_v21  ;;  %vm640_vm0 = vweird.f32 %v1084_v21 }
  0x2c   :  { %556 = vmatpush.bf16.msra.mxu1 %v1025_v31 }
  0x2d   :  { %569 = vmatpush.bf16.msra.mxu2 %v1033_v34  ;;  %v637_v29 = vsub.f32 1.0, %v636_v26 }
  0x2e   :  { %544 = vmatmul.bf16.vlgmr.msra.gmra.mxu0 %v186_v39  ;;  %582 = vmatpush.bf16.msra.mxu3 %v1041_v45 }
  0x2f   :  { %588 = vmatpush.bf16.msrb.mxu0 %v1056_v35  ;;  %557 = vmatmul.bf16.vlgmr.msra.gmra.mxu1 %v187_v41  ;;  %v638_v34 = vmul.f32 %v1084_v21, %v637_v29 }
  0x30   :  { %601 = vmatpush.bf16.msrb.mxu1 %v1064_v36  ;;  %570 = vmatmul.bf16.vlgmr.msra.gmra.mxu2 %v188_v40 }
  0x31   :  { %614 = vmatpush.bf16.msrb.mxu2 %v1072_v37  ;;  %583 = vmatmul.bf16.vlgmr.msra.gmra.mxu3 %v189_v50  ;;  %v639_v37 = vadd.f32 %v1084_v21, %v638_v34 }
  0x33   :  { %589 = vmatpush.bf16.msrb.mxu0 %v1055_v42  ;;  %v1218_v41 = vsel %vm640_vm0, %v1084_v21, %v639_v37 }
  0x34   :  { %602 = vmatpush.bf16.msrb.mxu1 %v1063_v43 }
  0x35   :  { %615 = vmatpush.bf16.msrb.mxu2 %v1071_v44 }
  0x37   :  { %590 = vmatpush.bf16.msrb.mxu0 %v1054_v47  ;;  %v689_v47 = vld [vmem:[#allocation6 + $0x70] sm:$0xff] }
  0x38   :  { %603 = vmatpush.bf16.msrb.mxu1 %v1062_v48  ;;  %v690_v48 = vld [vmem:[#allocation6 + $0x78] sm:$0xff] }
  0x39   :  { %616 = vmatpush.bf16.msrb.mxu2 %v1070_v49  ;;  %v698_v49 = vpack.c.bf16 %v690_v48, %v689_v47 }
  0x3b   :  { %591 = vmatpush.bf16.msrb.mxu0 %v1053_v51  ;;  %700 = vmatpush.bf16.msrb.mxu3 %v698_v49 }
  0x3c   :  { %604 = vmatpush.bf16.msrb.mxu1 %v1061_v52  ;;  %v687_v52 = vld [vmem:[#allocation6 + $0x60] sm:$0xff] }
  0x3d   :  { %617 = vmatpush.bf16.msrb.mxu2 %v1069_v53  ;;  %v688_v53 = vld [vmem:[#allocation6 + $0x68] sm:$0xff] }
  0x3f   :  { %592 = vmatpush.bf16.msrb.mxu0 %v1052_v54  ;;  %v697_v54 = vpack.c.bf16 %v688_v53, %v687_v52 }
  0x40   :  { %605 = vmatpush.bf16.msrb.mxu1 %v1060_v55 }
  0x41   :  { %618 = vmatpush.bf16.msrb.mxu2 %v1068_v56  ;;  %v685_v56 = vld [vmem:[#allocation6 + $0x50] sm:$0xff]  ;;  %701 = vmatpush.bf16.msrb.mxu3 %v697_v54 }
  0x43   :  { %593 = vmatpush.bf16.msrb.mxu0 %v1051_v57  ;;  %v686_v57 = vld [vmem:[#allocation6 + $0x58] sm:$0xff] }
  0x44   :  { %606 = vmatpush.bf16.msrb.mxu1 %v1059_v58  ;;  %v696_v58 = vpack.c.bf16 %v686_v57, %v685_v56 }
  0x45   :  { %619 = vmatpush.bf16.msrb.mxu2 %v1067_v59 }
  0x46   :  { %702 = vmatpush.bf16.msrb.mxu3 %v696_v58 }
  0x47   :  { %594 = vmatpush.bf16.msrb.mxu0 %v1050_v60  ;;  %v683_v60 = vld [vmem:[#allocation6 + $0x40] sm:$0xff] }
  0x48   :  { %607 = vmatpush.bf16.msrb.mxu1 %v1058_v62 }
  0x49   :  { %620 = vmatpush.bf16.msrb.mxu2 %v1066_v63  ;;  %v695_v63 = vpack.c.bf16 %v684_v61, %v683_v60 }
  0x4b   :  { %595 = vmatpush.bf16.msrb.mxu0 %v1049_v2  ;;  %v682_v2 = vld [vmem:[#allocation6 + $0x38] sm:$0xff]  ;;  %703 = vmatpush.bf16.msrb.mxu3 %v695_v63  ;;  %v713_v63 = vld [vmem:[#allocation6 + $0x82] sm:$0x1] }
  0x4c   :  { %608 = vmatpush.bf16.msrb.mxu1 %v1057_v5  ;;  %v694_v4 = vpack.c.bf16 %v682_v2, %v681_v1  ;;  %v679_v5 = vld [vmem:[#allocation6 + $0x20] sm:$0xff] }
  0x4d   :  { %621 = vmatpush.bf16.msrb.mxu2 %v1065_v6  ;;  %v680_v6 = vld [vmem:[#allocation6 + $0x28] sm:$0xff] }
  0x4e   :  { %596 = vmatmul.bf16.vlgmr.msrb.gmra.mxu0 %v190_v7  ;;  %v693_v7 = vpack.c.bf16 %v680_v6, %v679_v5 }
  0x4f   :  { %609 = vmatmul.bf16.vlgmr.msrb.gmra.mxu1 %v191_v8  ;;  %704 = vmatpush.bf16.msrb.mxu3 %v694_v4  ;;  %v677_v8 = vld [vmem:[#allocation6 + $0x10] sm:$0xff] }
  0x50   :  { %622 = vmatmul.bf16.vlgmr.msrb.gmra.mxu2 %v192_v9  ;;  %v678_v9 = vld [vmem:[#allocation6 + $0x18] sm:$0xff] }
  0x53   :  { %705 = vmatpush.bf16.msrb.mxu3 %v693_v7 }
  0xab   :  { %v545_v10 = vpop.f32.mrf.mxu0 }
  0xac   :  { %v558_v11 = vpop.f32.mrf.mxu1 }
  0xad   :  { %v559_v17 = vadd.f32 %v558_v11, %v545_v10 }
  0xb3   :  { %v571_v12 = vpop.f32.mrf.mxu2  ;;  %v547_v13 = vpop.f32.mrf.mxu0 }
  0xb4   :  { %v560_v14 = vpop.f32.mrf.mxu1  ;;  %v584_v15 = vpop.f32.mrf.mxu3  ;;  %v572_v20 = vadd.f32 %v571_v12, %v559_v17  ;;  %v692_v12 = vpack.c.bf16 %v678_v9, %v677_v8  ;;  %v675_v13 = vld [vmem:[#allocation6] sm:$0xff] }
  0xb5   :  { %v676_v14 = vld [vmem:[#allocation6 + $0x8] sm:$0xff] }
  0xb6   :  { %v585_v22 = vadd.f32 %v584_v15, %v572_v20  ;;  %706 = vmatpush.bf16.msrb.mxu3 %v692_v12  ;;  %v691_v17 = vpack.c.bf16 %v676_v14, %v675_v13  ;;  %v1081_v13 = vld [vmem:[#allocation6 + $0x84] ss:$0 sm:$0xff] }
  0xba   :  { %707 = vmatpush.bf16.msrb.mxu3 %v691_v17  ;;  %v1082_v17 = vld [vmem:[#allocation6 + $0x85] ss:$0 sm:$0xff] }
  0xbb   :  { %v573_v16 = vpop.f32.mrf.mxu2 }
  0xbc   :  { %v586_v18 = vpop.f32.mrf.mxu3 }
  0xcb   :  { %v597_v23 = vpop.f32.mrf.mxu0 }
  0xcc   :  { %v610_v24 = vpop.f32.mrf.mxu1  ;;  %v598_v25 = vadd.f32 %v597_v23, %v585_v22  ;;  %v628_v23 = vld [vmem:[#allocation6 + $0x81] sm:$0x1] }
  0xce   :  { %v611_v27 = vadd.f32 %v610_v24, %v598_v25 }
  0xd3   :  { %v623_v28 = vpop.f32.mrf.mxu2  ;;  %v599_v31 = vpop.f32.mrf.mxu0 }
  0xd4   :  { %v1214_v30 = vadd.f32 %v623_v28, %v611_v27  ;;  %v612_v32 = vpop.f32.mrf.mxu1 }
  0xd6   :  { %v629_v33 = vrot.slane %v1214_v30, 4 }
  0xd8   :  { %v630_v35 = vadd.f32 %v629_v33, %v1214_v30 }
  0xda   :  { %v631_v36 = vrot.slane %v630_v35, 2 }
  0xdb   :  { %v625_v38 = vpop.f32.mrf.mxu2 }
  0xdc   :  { %v632_v39 = vadd.f32 %v631_v36, %v630_v35 }
  0xde   :  { %v633_v40 = vrot.slane %v632_v39, 1 }
  0xe0   :  { %v634_v42 = vadd.f32 %v633_v40, %v632_v39 }
  0xe2   :  { %v642_v43 = vmul.f32 %v1218_v41, %v634_v42 }
  0xe4   :  { %v643_v44 = vsub.f32 %v1214_v30, %v642_v43 }
  0xe6   :  { %v644_v45 = vmul.f32 %v643_v44, %v643_v44 }
  0xe8   :  { %v645_v46 = vrot.slane %v644_v45, 4 }
  0xea   :  { %v646_v50 = vadd.f32 %v645_v46, %v644_v45 }
  0xec   :  { %v647_v51 = vrot.slane %v646_v50, 2 }
  0xee   :  { %v648_v55 = vadd.f32 %v647_v51, %v646_v50 }
  0xf0   :  { %v649_v59 = vrot.slane %v648_v55, 1 }
  0xf2   :  { %v650_v62 = vadd.f32 %v649_v59, %v648_v55 }
  0xf4   :  { %v651_v0 = vmul.f32 %v650_v62, %v1218_v41 }
  0xf6   :  { %v652_v3 = vadd.f32 1e-05, %v651_v0 }
  0xf8   :  { %1085 = vrsqrt.f32 %v652_v3  ;;  %vm659_vm2 = vweird.f32 %v652_v3 }
  0xfe   :  { %v1086_v10 = vpop.eup %1085 }
  0xff   :  { %v654_v11 = vmul.f32 %v1086_v10, %v652_v3  ;;  %vm660_vm1 = vweird.f32 %v1086_v10  ;;  %v714_v3 = vld [vmem:[#allocation6 + $0x83] sm:$0x1] }
 0x100   :  { %vm661_vm3 = vmor %vm659_vm2, %vm660_vm1 }
 0x101   :  { %v655_v15 = vmul.f32 %v1086_v10, %v654_v11 }
 0x103   :  { %v656_v16 = vmul.f32 0.5, %v655_v15 }
 0x105   :  { %v657_v18 = vsub.f32 1.5, %v656_v16 }
 0x107   :  { %v658_v20 = vmul.f32 %v1086_v10, %v657_v18 }
 0x109   :  { %v662_v21 = vsel %vm661_vm3, %v1086_v10, %v658_v20 }
 0x10a   :  { %v663_v22 = vmul.f32 %v662_v21, %v627_v19 }
 0x10c   :  { %v664_v24 = vmul.f32 %v663_v22, %v642_v43  ;;  %v666_v25 = vperm.slane %v663_v22, 0 }
 0x10e   :  { %v665_v26 = vsub.f32 %v628_v23, %v664_v24  ;;  %v667_v27 = vmul.f32 %v666_v25, %v1214_v30 }
 0x110   :  { %v668_v28 = vperm.slane %v665_v26, 0 }
 0x112   :  { %v669_v29 = vadd.f32 %v668_v28, %v667_v27 }
 0x114   :  { %v670_v31 = vsub.f32 0.0, %v669_v29 }
 0x116   :  { %v671_v32 = vmul.f32 1.442695, %v670_v31 }
 0x118   :  { %1087 = vpow2.f32 %v671_v32 }
 0x11e   :  { %v1088_v33 = vpop.eup %1087 }
 0x11f   :  { %v673_v34 = vadd.f32 1.0, %v1088_v33 }
 0x121   :  { %1089 = vrcp.f32 %v673_v34 }
 0x127   :  { %v1090_v35 = vpop.eup %1089 }
 0x128   :  { %v699_v36 = vpack.c.bf16 %v1090_v35, %v1090_v35 }
 0x12a   :  { %708 = vmatmul.bf16.vlgmr.msrb.gmra.mxu3 %v699_v36 }
 0x1ad   :  { %v709_v37 = vpop.f32.mrf.mxu3 }
 0x1ae   :  { %v716_v38 = vsel %vm715_vm4, %v709_v37, 0.0 }
 0x1af   :  { %v717_v39 = vrot.slane %v716_v38, 4 }
 0x1b1   :  { %v718_v40 = vadd.f32 %v717_v39, %v716_v38 }
 0x1b3   :  { %v719_v42 = vrot.slane %v718_v40, 2 }
 0x1b5   :  { %v711_v43 = vpop.f32.mrf.mxu3  ;;  %v720_v30 = vadd.f32 %v719_v42, %v718_v40 }
 0x1b7   :  { %v721_v44 = vrot.slane %v720_v30, 1 }
 0x1b9   :  { %v722_v45 = vadd.f32 %v721_v44, %v720_v30 }
 0x1bb   :  { %v723_v46 = vmul.f32 %v722_v45, %v1218_v41 }
 0x1bd   :  { %v724_v47 = vsub.f32 %v709_v37, %v723_v46 }
 0x1bf   :  { %v725_v48 = vmul.f32 %v724_v47, %v724_v47 }
 0x1c1   :  { %v726_v49 = vsel %vm715_vm4, %v725_v48, 0.0 }
 0x1c2   :  { %v727_v50 = vrot.slane %v726_v49, 4 }
 0x1c4   :  { %v728_v51 = vadd.f32 %v727_v50, %v726_v49 }
 0x1c6   :  { %v729_v52 = vrot.slane %v728_v51, 2 }
 0x1c8   :  { %v730_v53 = vadd.f32 %v729_v52, %v728_v51 }
 0x1ca   :  { %v731_v54 = vrot.slane %v730_v53, 1 }
 0x1cc   :  { %v732_v55 = vadd.f32 %v731_v54, %v730_v53 }
 0x1ce   :  { %v733_v56 = vmul.f32 %v732_v55, %v1218_v41 }
 0x1d0   :  { %v734_v57 = vadd.f32 1e-05, %v733_v56 }
 0x1d2   :  { %1091 = vrsqrt.f32 %v734_v57  ;;  %vm741_vm6 = vweird.f32 %v734_v57 }
 0x1d8   :  { %v1092_v58 = vpop.eup %1091 }
 0x1d9   :  { %v736_v59 = vmul.f32 %v1092_v58, %v734_v57  ;;  %vm742_vm5 = vweird.f32 %v1092_v58 }
 0x1da   :  { %vm743_vm7 = vmor %vm741_vm6, %vm742_vm5 }
 0x1db   :  { %v737_v60 = vmul.f32 %v1092_v58, %v736_v59 }
 0x1dd   :  { %v738_v61 = vmul.f32 0.5, %v737_v60 }
 0x1df   :  { %v739_v62 = vsub.f32 1.5, %v738_v61 }
 0x1e1   :  { %v740_v0 = vmul.f32 %v1092_v58, %v739_v62 }
 0x1e3   :  { %v744_v1 = vsel %vm743_vm7, %v1092_v58, %v740_v0 }
 0x1e4   :  { %v745_v2 = vmul.f32 %v744_v1, %v713_v63 }
 0x1e6   :  { %v746_v4 = vmul.f32 %v745_v2, %v723_v46  ;;  %v748_v5 = vperm.slane %v745_v2, 0 }
 0x1e8   :  { %v747_v6 = vsub.f32 %v714_v3, %v746_v4  ;;  %v749_v7 = vmul.f32 %v748_v5, %v709_v37 }
 0x1ea   :  { %v750_v41 = vperm.slane %v747_v6, 0 }
 0x1ec   :  { %v751_v8 = vadd.f32 %v750_v41, %v749_v7 }
 0x1ee   :  { %v752_v9 = vsub.f32 0.0, %v751_v8 }
 0x1f0   :  { %v753_v10 = vmul.f32 1.442695, %v752_v9 }
 0x1f2   :  { %1093 = vpow2.f32 %v753_v10 }
 0x1f8   :  { %v1094_v11 = vpop.eup %1093 }
 0x1f9   :  { %v755_v12 = vadd.f32 1.0, %v1094_v11 }
 0x1fb   :  { %1095 = vrcp.f32 %v755_v12 }
 0x201   :  { %v1096_v14 = vpop.eup %1095 }
 0x202   :  { %v760_v15 = vmul.f32 %v1096_v14, %v1081_v13 }
 0x204   :  { %v761_v16 = vsel %vm715_vm4, %v760_v15, 0.0 }
 0x205   :  { %762 = vadd.xlane.f32.xlu0 %v761_v16 }
 0x278   :  { %v763_v18 = vpop.xlane.xlu0 %762 }
 0x279   :  { %v765_v19 = vadd.f32 %v1082_v17, %v763_v18 }
 0x27b   :  { %v766_v20 = vsub.f32 0.0, %v765_v19 }
 0x27d   :  { %v767_v21 = vmul.f32 1.442695, %v766_v20 }
 0x27f   :  { %1097 = vpow2.f32 %v767_v21 }
 0x285   :  { %v1098_v22 = vpop.eup %1097 }
 0x286   :  { %v769_v23 = vadd.f32 1.0, %v1098_v22 }
 0x288   :  { %1099 = vrcp.f32 %v769_v23  ;;  %v781_v27 = vand.u32 2147483648, %v769_v23  ;;  %v779_v29 = vand.u32 2147483647, %v769_v23  ;;  %vm775_vm9 = vweird.f32 %v769_v23 }
 0x28a   :  { %v782_v32 = vor.u32 1.1754944e-38, %v781_v27  ;;  %vm780_vm12 = vcmp.eq.f32.partialorder %v779_v29, 8.507059e+37 }
 0x28e   :  { %v1100_v24 = vpop.eup %1099 }
 0x28f   :  { %v771_v25 = vmul.f32 %v1100_v24, %v769_v23  ;;  %vm776_vm8 = vweird.f32 %v1100_v24 }
 0x290   :  { %vm777_vm10 = vmor %vm775_vm9, %vm776_vm8 }
 0x291   :  { %v772_v26 = vsub.f32 1.0, %v771_v25 }
 0x293   :  { %v773_v28 = vmul.f32 %v1100_v24, %v772_v26 }
 0x295   :  { %v774_v31 = vadd.f32 %v1100_v24, %v773_v28 }
 0x297   :  { %v778_v33 = vsel %vm777_vm10, %v1100_v24, %v774_v31 }
 0x298   :  { %v783_v34 = vsel %vm780_vm12, %v782_v32, %v778_v33 }
 0x299   :  { %786 = vst.msk [vmem:[%s1235_s3] sm:$0xff] %vm785_vm11, %v783_v34 }
 0x29a   :  { %791 = vsyncpa [#allocation3], 1 }
 0x29b   :  { %792 = vsyncpa [#allocation5], 1 }

</bundles_post_ra>
